<compile_context>
chip_gen: v5e
topology: v5e:2x2
jax: 0.10.0
libtpu: 0.0.40
codegen_flags: <defaults>
</compile_context>

<pallas_src>
import functools

import jax
import jax.numpy as jnp
from jax.experimental import pallas as pl
from jax.experimental.pallas import tpu as pltpu


# ---------------------------------------------------------------------------
# Kernel
# ---------------------------------------------------------------------------
def _ffn_kernel(x_ref, w1_ref, w3_ref, w2_ref, o_ref, acc_ref):
    """Fused SwiGLU FFN.

    Grid axis 0: token tiles ("parallel").
    Grid axis 1: hidden-dim tiles ("arbitrary" reduction for the w2 matmul).
    For each hidden tile the gated activation is produced on the fly and
    immediately contracted with the matching w2 row-tile, accumulating in f32.
    """
    k = pl.program_id(1)

    @pl.when(k == 0)
    def _init():
        acc_ref[...] = jnp.zeros_like(acc_ref)

    x = x_ref[...]                                               # (tm, dim)
    gate = jnp.dot(x, w1_ref[...], preferred_element_type=jnp.float32)
    up = jnp.dot(x, w3_ref[...], preferred_element_type=jnp.float32)
    # silu(g) = g * sigmoid(g); gate math kept in f32 (sigmoid runs on EUP).
    h = (gate * jax.nn.sigmoid(gate)) * up                       # (tm, tk) f32

    # Intentional: h is rounded to the weight dtype so the second matmul runs
    # at bf16 MXU peak; the f32 accumulator keeps the reduction exact.
    acc_ref[...] += jnp.dot(h.astype(w2_ref.dtype), w2_ref[...],
                            preferred_element_type=jnp.float32)  # (tm, dim)

    @pl.when(k == pl.num_programs(1) - 1)
    def _finalize():
        o_ref[...] = acc_ref[...].astype(o_ref.dtype)


# ---------------------------------------------------------------------------
# Tiling / VMEM heuristics
# ---------------------------------------------------------------------------
def _round_up(x, m):
    return ((x + m - 1) // m) * m


def _cdiv(a, b):
    return (a + b - 1) // b


def _largest_aligned_divisor(size, target, align):
    """Largest multiple of `align` <= target that divides `size`; else `size`."""
    t = min(target, size)
    t = (t // align) * align
    while t >= align:
        if size % t == 0:
            return t
        t -= align
    return size


def _vmem_capacity_bytes():
    try:
        return int(pltpu.get_tpu_info().vmem_capacity_bytes)
    except Exception:
        return 64 << 20  # conservative (v7x-sized) fallback


def _vmem_estimate(tm, tk, dim, itemsize):
    # Double-buffered pipeline tiles (x, w1, w3, w2, out), f32 accumulator
    # scratch, and the in-kernel f32 temporaries (gate, up, h).
    tiles = tm * dim + 2 * (dim * tk) + tk * dim + tm * dim
    return 2 * itemsize * tiles + 4 * tm * dim + 3 * 4 * tm * tk


def _choose_tiles(M, dim, hidden, itemsize):
    vmem_cap = _vmem_capacity_bytes()
    if vmem_cap >= (100 << 20):
        # v5e / v6e: 128 MiB VMEM.  Large token tiles push the kernel onto the
        # MXU roofline (arithmetic intensity ~ tm FLOP per weight byte).
        tm_target, tk_target = 768, 512
        budget = min(vmem_cap - (24 << 20), 100 << 20)
    else:
        # v7x: ~64 MiB VMEM per TensorCore.  Smaller tk, modest tm, and leave
        # the compiler headroom for internal scratch.
        tm_target, tk_target = 512, 256
        budget = min(max(vmem_cap - (12 << 20), 16 << 20), 52 << 20)

    sub_align = 16 if itemsize == 2 else 8
    tk = _largest_aligned_divisor(hidden, tk_target, 128)

    tm = min(tm_target, _round_up(M, sub_align))
    tm = max(_round_up(tm, sub_align), sub_align)

    # Megacore: prefer >= 2 token tiles so both TensorCores (v7x) get work.
    if _cdiv(M, tm) < 2:
        candidate = max(_round_up(_cdiv(M, 2), sub_align), sub_align)
        if candidate < tm:
            tm = candidate

    # Shrink tiles until the double-buffered footprint fits the VMEM budget.
    while _vmem_estimate(tm, tk, dim, itemsize) > budget:
        if tm > 2 * sub_align:
            tm = max(_round_up(tm // 2, sub_align), sub_align)
        else:
            new_tk = _largest_aligned_divisor(hidden, max(tk // 2, 128), 128)
            if new_tk < tk:
                tk = new_tk
            else:
                break

    est = _vmem_estimate(tm, tk, dim, itemsize)
    vmem_limit = int(min(max(int(est * 1.25) + (2 << 20), 32 << 20), budget))
    return tm, tk, vmem_limit


# ---------------------------------------------------------------------------
# Wrapper
# ---------------------------------------------------------------------------
@functools.partial(jax.jit, static_argnames=("tm", "tk", "vmem_limit"))
def _ffn_call(x2d, w1, w3, w2, *, tm, tk, vmem_limit):
    M, dim = x2d.shape
    hidden = w1.shape[1]
    itemsize = jnp.dtype(x2d.dtype).itemsize

    # Pad ragged M up to a multiple of tm (never shrink tiles for odd M).
    M_pad = _round_up(M, tm)
    if M_pad != M:
        x2d = jnp.pad(x2d, ((0, M_pad - M), (0, 0)))
    grid_m = M_pad // tm
    grid_k = hidden // tk

    cost = pl.CostEstimate(
        flops=6 * M_pad * dim * hidden,            # three (M, dim, hidden) matmuls
        transcendentals=M_pad * hidden,            # sigmoid
        # Weights are re-streamed once per token tile.
        bytes_accessed=itemsize * (2 * M_pad * dim + grid_m * 3 * dim * hidden),
    )

    out2d = pl.pallas_call(
        _ffn_kernel,
        out_shape=jax.ShapeDtypeStruct((M_pad, dim), x2d.dtype),
        grid_spec=pltpu.PrefetchScalarGridSpec(
            num_scalar_prefetch=0,
            grid=(grid_m, grid_k),
            in_specs=[
                pl.BlockSpec((tm, dim), lambda i, k: (i, 0)),    # x tile
                pl.BlockSpec((dim, tk), lambda i, k: (0, k)),    # w1 tile
                pl.BlockSpec((dim, tk), lambda i, k: (0, k)),    # w3 tile
                pl.BlockSpec((tk, dim), lambda i, k: (k, 0)),    # w2 tile
            ],
            out_specs=pl.BlockSpec((tm, dim), lambda i, k: (i, 0)),
            scratch_shapes=[pltpu.VMEM((tm, dim), jnp.float32)],
        ),
        compiler_params=pltpu.CompilerParams(
            dimension_semantics=("parallel", "arbitrary"),
            vmem_limit_bytes=vmem_limit,
        ),
        cost_estimate=cost,
    )(x2d, w1, w3, w2)

    if M_pad != M:
        out2d = out2d[:M]
    return out2d


def feed_forward(x, w1, w3, w2):
    """x: (batch, seq, dim); w1, w3: (dim, hidden); w2: (hidden, dim).

    Weights are pre-transposed relative to torch nn.Linear, i.e. y = x @ W.
    """
    b, s, dim = x.shape
    hidden = w1.shape[1]
    M = b * s
    itemsize = jnp.dtype(x.dtype).itemsize
    tm, tk, vmem_limit = _choose_tiles(M, dim, hidden, itemsize)
    out2d = _ffn_call(x.reshape(M, dim), w1, w3, w2,
                      tm=tm, tk=tk, vmem_limit=vmem_limit)
    return out2d.reshape(b, s, dim)


# ---------------------------------------------------------------------------
# Reference + test
# ---------------------------------------------------------------------------
def _reference(x, w1, w3, w2):
    g = x @ w1
    u = x @ w3
    h = (g * jax.nn.sigmoid(g)) * u
    return h @ w2


if __name__ == "__main__":
    # Small ModelArgs-consistent shapes: dim=64, hidden_dim=256.
    batch, seq, dim, hidden = 2, 8, 64, 256

    key = jax.random.PRNGKey(0)
    kx, k1, k2, k3 = jax.random.split(key, 4)

    dtype = jnp.bfloat16  # production config: bf16 weights/activations, f32 acc
    x = jax.random.normal(kx, (batch, seq, dim), jnp.float32).astype(dtype)
    # Deterministic "init_method"-style weights (scaled normal), pre-transposed
    # relative to PyTorch nn.Linear: w1, w3: (dim, hidden); w2: (hidden, dim).
    w1 = (jax.random.normal(k1, (dim, hidden), jnp.float32) * dim ** -0.5).astype(dtype)
    w3 = (jax.random.normal(k3, (dim, hidden), jnp.float32) * dim ** -0.5).astype(dtype)
    w2 = (jax.random.normal(k2, (hidden, dim), jnp.float32) * hidden ** -0.5).astype(dtype)

    out = feed_forward(x, w1, w3, w2)
    jax.block_until_ready(out)

    ref = _reference(x.astype(jnp.float32), w1.astype(jnp.float32),
                     w3.astype(jnp.float32), w2.astype(jnp.float32))
    assert out.shape == (batch, seq, dim)
    err = float(jnp.max(jnp.abs(out.astype(jnp.float32) - ref)))
    assert err < 5e-2, f"mismatch vs reference: max abs err {err}"

    print("KERNEL_OK")
</pallas_src>

<mosaic_0001>
module attributes {stable_mosaic.version = 11 : i64} {
  func.func @_ffn_kernel(%arg0: i32, %arg1: i32, %arg2: memref<16x64xbf16, #tpu.memory_space<vmem>>, %arg3: memref<64x256xbf16, #tpu.memory_space<vmem>>, %arg4: memref<64x256xbf16, #tpu.memory_space<vmem>>, %arg5: memref<256x64xbf16, #tpu.memory_space<vmem>>, %arg6: memref<16x64xbf16, #tpu.memory_space<vmem>>, %arg7: memref<16x64xf32, #tpu.memory_space<vmem>>) attributes {dimension_semantics = [#tpu.dimension_semantics<parallel>, #tpu.dimension_semantics<arbitrary>], iteration_bounds = array<i64: 1, 1>, scalar_prefetch = 0 : i64, scratch_operands = 1 : i64, tpu.core_type = #tpu.core_type<tc>, window_params = [{transform_indices = @transform_0, window_bounds = array<i64: 16, 64>}, {transform_indices = @transform_1, window_bounds = array<i64: 64, 256>}, {transform_indices = @transform_2, window_bounds = array<i64: 64, 256>}, {transform_indices = @transform_3, window_bounds = array<i64: 256, 64>}, {transform_indices = @transform_4, window_bounds = array<i64: 16, 64>}]} {
    %c0_i32 = arith.constant 0 : i32
    %0 = arith.cmpi eq, %arg1, %c0_i32 : i32
    %1 = arith.extui %0 : i1 to i32
    %c0_i32_0 = arith.constant 0 : i32
    %2 = arith.cmpi ne, %1, %c0_i32_0 : i32
    scf.if %2 {
      %cst_17 = arith.constant 0.000000e+00 : f32
      %24 = vector.broadcast %cst_17 : f32 to vector<16x64xf32>
      %c0_18 = arith.constant 0 : index
      %c0_19 = arith.constant 0 : index
      %25 = vector.load %arg7[%c0_18, %c0_19] : memref<16x64xf32, #tpu.memory_space<vmem>>, vector<16x64xf32>
      tpu.vector_store %arg7[%c0_18, %c0_19], %24 {strides = array<i32>} : memref<16x64xf32, #tpu.memory_space<vmem>>, vector<16x64xf32>,
    } else {
    }
    %c0 = arith.constant 0 : index
    %c0_1 = arith.constant 0 : index
    %3 = vector.load %arg2[%c0, %c0_1] : memref<16x64xbf16, #tpu.memory_space<vmem>>, vector<16x64xbf16>
    %c0_2 = arith.constant 0 : index
    %c0_3 = arith.constant 0 : index
    %4 = vector.load %arg3[%c0_2, %c0_3] : memref<64x256xbf16, #tpu.memory_space<vmem>>, vector<64x256xbf16>
    %cst = arith.constant dense<0.000000e+00> : vector<16x256xf32>
    %5 = tpu.matmul %3, %4, %cst {dimension_numbers = #tpu.dot_dimension_numbers<[1], [0], [0], [1], [0, 0, 1, 1], [], []>} : vector<16x64xbf16>, vector<64x256xbf16>, vector<16x256xf32> -> vector<16x256xf32>
    %c0_4 = arith.constant 0 : index
    %c0_5 = arith.constant 0 : index
    %6 = vector.load %arg4[%c0_4, %c0_5] : memref<64x256xbf16, #tpu.memory_space<vmem>>, vector<64x256xbf16>
    %cst_6 = arith.constant dense<0.000000e+00> : vector<16x256xf32>
    %7 = tpu.matmul %3, %6, %cst_6 {dimension_numbers = #tpu.dot_dimension_numbers<[1], [0], [0], [1], [0, 0, 1, 1], [], []>} : vector<16x64xbf16>, vector<64x256xbf16>, vector<16x256xf32> -> vector<16x256xf32>
    %8 = arith.negf %5 : vector<16x256xf32>
    %9 = math.exp %8 : vector<16x256xf32>
    %cst_7 = arith.constant 1.000000e+00 : f32
    %10 = vector.broadcast %cst_7 : f32 to vector<16x256xf32>
    %11 = arith.addf %10, %9 : vector<16x256xf32>
    %12 = arith.divf %10, %11 : vector<16x256xf32>
    %13 = arith.mulf %5, %12 : vector<16x256xf32>
    %14 = arith.mulf %13, %7 : vector<16x256xf32>
    %c0_8 = arith.constant 0 : index
    %c0_9 = arith.constant 0 : index
    %15 = vector.load %arg7[%c0_8, %c0_9] : memref<16x64xf32, #tpu.memory_space<vmem>>, vector<16x64xf32>
    %16 = arith.truncf %14 : vector<16x256xf32> to vector<16x256xbf16>
    %c0_10 = arith.constant 0 : index
    %c0_11 = arith.constant 0 : index
    %17 = vector.load %arg5[%c0_10, %c0_11] : memref<256x64xbf16, #tpu.memory_space<vmem>>, vector<256x64xbf16>
    %cst_12 = arith.constant dense<0.000000e+00> : vector<16x64xf32>
    %18 = tpu.matmul %16, %17, %cst_12 {dimension_numbers = #tpu.dot_dimension_numbers<[1], [0], [0], [1], [0, 0, 1, 1], [], []>} : vector<16x256xbf16>, vector<256x64xbf16>, vector<16x64xf32> -> vector<16x64xf32>
    %19 = arith.addf %15, %18 : vector<16x64xf32>
    %c0_13 = arith.constant 0 : index
    %c0_14 = arith.constant 0 : index
    %20 = vector.load %arg7[%c0_13, %c0_14] : memref<16x64xf32, #tpu.memory_space<vmem>>, vector<16x64xf32>
    tpu.vector_store %arg7[%c0_13, %c0_14], %19 {strides = array<i32>} : memref<16x64xf32, #tpu.memory_space<vmem>>, vector<16x64xf32>,
    %c0_i32_15 = arith.constant 0 : i32
    %21 = arith.cmpi eq, %arg1, %c0_i32_15 : i32
    %22 = arith.extui %21 : i1 to i32
    %c0_i32_16 = arith.constant 0 : i32
    %23 = arith.cmpi ne, %22, %c0_i32_16 : i32
    scf.if %23 {
      %c0_17 = arith.constant 0 : index
      %c0_18 = arith.constant 0 : index
      %24 = vector.load %arg7[%c0_17, %c0_18] : memref<16x64xf32, #tpu.memory_space<vmem>>, vector<16x64xf32>
      %25 = arith.truncf %24 : vector<16x64xf32> to vector<16x64xbf16>
      %c0_19 = arith.constant 0 : index
      %c0_20 = arith.constant 0 : index
      %26 = vector.load %arg6[%c0_19, %c0_20] : memref<16x64xbf16, #tpu.memory_space<vmem>>, vector<16x64xbf16>
      tpu.vector_store %arg6[%c0_19, %c0_20], %25 {strides = array<i32>} : memref<16x64xbf16, #tpu.memory_space<vmem>>, vector<16x64xbf16>,
    } else {
    }
    return
  }
  func.func @transform_0(%arg0: i32, %arg1: i32) -> (i32, i32) {
    %c0_i32 = arith.constant 0 : i32
    %c0_i32_0 = arith.constant 0 : i32
    return %arg0, %c0_i32 : i32, i32
  }
  func.func @transform_1(%arg0: i32, %arg1: i32) -> (i32, i32) {
    %c0_i32 = arith.constant 0 : i32
    %c0_i32_0 = arith.constant 0 : i32
    return %c0_i32, %arg1 : i32, i32
  }
  func.func @transform_2(%arg0: i32, %arg1: i32) -> (i32, i32) {
    %c0_i32 = arith.constant 0 : i32
    %c0_i32_0 = arith.constant 0 : i32
    return %c0_i32, %arg1 : i32, i32
  }
  func.func @transform_3(%arg0: i32, %arg1: i32) -> (i32, i32) {
    %c0_i32 = arith.constant 0 : i32
    %c0_i32_0 = arith.constant 0 : i32
    return %arg1, %c0_i32 : i32, i32
  }
  func.func @transform_4(%arg0: i32, %arg1: i32) -> (i32, i32) {
    %c0_i32 = arith.constant 0 : i32
    %c0_i32_0 = arith.constant 0 : i32
    return %arg0, %c0_i32 : i32, i32
  }
}

</mosaic_0001>

<bundles_post_ra>
// kernel: _ffn_call.1
= control target key start
LH: loop header
LB: loop body
LE: loop exit
PB: predicated region body
PF: predicated region fallthrough
CT: control target
= control target key end

     0   :  { %s899_s0 = inlined_call_operand.vmem [shape: bf16[16,64], index: 0, kind: input, shape index: {}]   ;;  %s900_s1 = inlined_call_operand.vmem [shape: bf16[64,256], index: 1, kind: input, shape index: {}]   ;;  %s901_s2 = inlined_call_operand.vmem [shape: bf16[64,256], index: 2, kind: input, shape index: {}]   ;;  %s902_s3 = inlined_call_operand.vmem [shape: bf16[256,64], index: 3, kind: input, shape index: {}]   ;;  %s903_s4 = inlined_call_operand.hbm [shape: bf16[16,64], index: 4, kind: output, shape index: {}]  }
   0x1   :  { %v495_v0 = vld [vmem:[%s900_s1 + $0x30] sm:$0xf]  ;;  %v613_v1 = vld [vmem:[%s900_s1 + $0x34] sm:$0xf0]  ;;  %v612_v2 = vld [vmem:[%s900_s1 + $0x34] sm:$0xf] }
   0x2   :  { %v496_v3 = vor.u32 %v613_v1, %v495_v0  ;;  %v497_v4 = vld [vmem:[%s900_s1 + $0x38] sm:$0xf0]  ;;  %v487_v5 = vld [vmem:[%s900_s1 + $0x20] sm:$0xf]  ;;  %v611_v6 = vld [vmem:[%s900_s1 + $0x24] sm:$0xf0] }
   0x3   :  { %v500_v7 = vor.u32 %v612_v2, %v497_v4  ;;  %v610_v8 = vld [vmem:[%s900_s1 + $0x24] sm:$0xf]  ;;  %v489_v9 = vld [vmem:[%s900_s1 + $0x28] sm:$0xf0]  ;;  %v488_v10 = vor.u32 %v611_v6, %v487_v5  ;;  %v479_v12 = vld [vmem:[%s900_s1 + $0x10] sm:$0xf] }
   0x4   :  { %89 = vmatpush.bf16.msra.mxu2 %v496_v3  ;;  %v492_v11 = vor.u32 %v610_v8, %v489_v9  ;;  %v609_v13 = vld [vmem:[%s900_s1 + $0x14] sm:$0xf0]  ;;  %v608_v14 = vld [vmem:[%s900_s1 + $0x14] sm:$0xf]  ;;  %v481_v15 = vld [vmem:[%s900_s1 + $0x18] sm:$0xf0] }
   0x5   :  { %103 = vmatpush.bf16.msra.mxu3 %v500_v7  ;;  %v480_v16 = vor.u32 %v609_v13, %v479_v12  ;;  %v484_v17 = vor.u32 %v608_v14, %v481_v15  ;;  %v471_v18 = vld [vmem:[%s900_s1] sm:$0xf]  ;;  %v607_v19 = vld [vmem:[%s900_s1 + $0x4] sm:$0xf0]  ;;  %v606_v20 = vld [vmem:[%s900_s1 + $0x4] sm:$0xf] }
   0x6   :  { %v473_v21 = vld [vmem:[%s900_s1 + $0x8] sm:$0xf0]  ;;  %v529_v22 = vld [vmem:[%s901_s2 + $0x30] sm:$0xf]  ;;  %v621_v23 = vld [vmem:[%s901_s2 + $0x34] sm:$0xf0]  ;;  %v472_v26 = vor.u32 %v607_v19, %v471_v18 }
   0x7   :  { %v620_v24 = vld [vmem:[%s901_s2 + $0x34] sm:$0xf]  ;;  %v531_v25 = vld [vmem:[%s901_s2 + $0x38] sm:$0xf0] }
   0x8   :  { %90 = vmatpush.bf16.msra.mxu2 %v488_v10 }
   0x9   :  { %104 = vmatpush.bf16.msra.mxu3 %v492_v11 }
   0xc   :  { %91 = vmatpush.bf16.msra.mxu2 %v480_v16 }
   0xd   :  { %9 = vsyncpa [#allocation4], 0  ;;  %105 = vmatpush.bf16.msra.mxu3 %v484_v17  ;;  %v476_v27 = vor.u32 %v606_v20, %v473_v21  ;;  %v530_v28 = vor.u32 %v621_v23, %v529_v22  ;;  %v534_v29 = vor.u32 %v620_v24, %v531_v25  ;;  %v521_v30 = vld [vmem:[%s901_s2 + $0x20] sm:$0xf]  ;;  %v619_v31 = vld [vmem:[%s901_s2 + $0x24] sm:$0xf0] }
   0xe   :  { %v605_v32 = vld [vmem:[%s899_s0] sm:$0xff]  ;;  %v523_v34 = vld [vmem:[%s901_s2 + $0x28] sm:$0xf0]  ;;  %vm23_vm0 = vcmask 523264   ;;  %v522_v35 = vor.u32 %v619_v31, %v521_v30  ;;  %v513_v37 = vld [vmem:[%s901_s2 + $0x10] sm:$0xf] }
   0xf   :  { %v618_v33 = vld [vmem:[%s901_s2 + $0x24] sm:$0xf]  ;;  %v617_v38 = vld [vmem:[%s901_s2 + $0x14] sm:$0xf0]  ;;  %v616_v39 = vld [vmem:[%s901_s2 + $0x14] sm:$0xf] }
  0x10   :  { %92 = vmatpush.bf16.msra.mxu2 %v472_v26  ;;  %v526_v36 = vor.u32 %v618_v33, %v523_v34  ;;  %v515_v40 = vld [vmem:[%s901_s2 + $0x18] sm:$0xf0]  ;;  %v514_v41 = vor.u32 %v617_v38, %v513_v37  ;;  %v505_v43 = vld [vmem:[%s901_s2] sm:$0xf]  ;;  %v615_v44 = vld [vmem:[%s901_s2 + $0x4] sm:$0xf0] }
  0x11   :  { %106 = vmatpush.bf16.msra.mxu3 %v476_v27  ;;  %v518_v42 = vor.u32 %v616_v39, %v515_v40  ;;  %v614_v45 = vld [vmem:[%s901_s2 + $0x4] sm:$0xf]  ;;  %v507_v46 = vld [vmem:[%s901_s2 + $0x8] sm:$0xf0]  ;;  %v506_v47 = vor.u32 %v615_v44, %v505_v43  ;;  %v629_v49 = vld [vmem:[%s902_s3 + $0x38] sm:$0xff]  ;;  %s453_s5 = sshll.u32 %s903_s4, 4  ;;  %s454_s5 = int_to_ptr.hbm [resolvable:$true] %s453_s5 }
  0x12   :  { %v510_v48 = vor.u32 %v614_v45, %v507_v46  ;;  %v637_v50 = vld [vmem:[%s902_s3 + $0x78] sm:$0xff]  ;;  %405 = vmatpush.bf16.msra.mxu0 %v629_v49  ;;  %v628_v51 = vld [vmem:[%s902_s3 + $0x30] sm:$0xff]  ;;  %v627_v53 = vld [vmem:[%s902_s3 + $0x28] sm:$0xff]  ;;  %s686_s6 = smov 64   ;;  %s687_s7 = smov 4  }
  0x13   :  { %501 = vmatmul.msk.bf16.vlgmr.msra.gmra.mxu2 %vm23_vm0, %v605_v32  ;;  %419 = vmatpush.bf16.msra.mxu1 %v637_v50  ;;  %v636_v52 = vld [vmem:[%s902_s3 + $0x70] sm:$0xff]  ;;  %v635_v54 = vld [vmem:[%s902_s3 + $0x68] sm:$0xff]  ;;  %v626_v55 = vld [vmem:[%s902_s3 + $0x20] sm:$0xff] }
  0x14   :  { %165 = vmatpush.bf16.msrb.mxu2 %v530_v28  ;;  %502 = vmatmul.msk.bf16.vlgmr.msra.gmra.mxu3 %vm23_vm0, %v605_v32  ;;  %v634_v56 = vld [vmem:[%s902_s3 + $0x60] sm:$0xff]  ;;  %v625_v57 = vld [vmem:[%s902_s3 + $0x18] sm:$0xff]  ;;  %v624_v63 = vld [vmem:[%s902_s3 + $0x10] sm:$0xff] }
  0x15   :  { %179 = vmatpush.bf16.msrb.mxu3 %v534_v29  ;;  %v633_v58 = vld [vmem:[%s902_s3 + $0x58] sm:$0xff]  ;;  %v632_v0 = vld [vmem:[%s902_s3 + $0x50] sm:$0xff]  ;;  %v623_v1 = vld [vmem:[%s902_s3 + $0x8] sm:$0xff] }
  0x16   :  { %406 = vmatpush.bf16.msra.mxu0 %v628_v51  ;;  %v631_v2 = vld [vmem:[%s902_s3 + $0x48] sm:$0xff]  ;;  %v622_v10 = vld [vmem:[%s902_s3] sm:$0xff] }
  0x17   :  { %420 = vmatpush.bf16.msra.mxu1 %v636_v52  ;;  %v630_v11 = vld [vmem:[%s902_s3 + $0x40] sm:$0xff]  ;;  %s685_s3 = smov [#allocation3]  }
  0x18   :  { %166 = vmatpush.bf16.msrb.mxu2 %v522_v35  ;;  %s451_s29 = sshll.u32 %s685_s3, 4  ;;  %s452_s29 = int_to_ptr.vmem [resolvable:$true] %s451_s29 }
  0x19   :  { %180 = vmatpush.bf16.msrb.mxu3 %v526_v36 }
  0x1a   :  { %407 = vmatpush.bf16.msra.mxu0 %v627_v53 }
  0x1b   :  { %421 = vmatpush.bf16.msra.mxu1 %v635_v54 }
  0x1c   :  { %167 = vmatpush.bf16.msrb.mxu2 %v514_v41 }
  0x1d   :  { %181 = vmatpush.bf16.msrb.mxu3 %v518_v42 }
  0x1e   :  { %408 = vmatpush.bf16.msra.mxu0 %v626_v55 }
  0x1f   :  { %422 = vmatpush.bf16.msra.mxu1 %v634_v56 }
  0x20   :  { %168 = vmatpush.bf16.msrb.mxu2 %v506_v47 }
  0x21   :  { %182 = vmatpush.bf16.msrb.mxu3 %v510_v48 }
  0x22   :  { %409 = vmatpush.bf16.msra.mxu0 %v625_v57 }
  0x23   :  { %535 = vmatmul.msk.bf16.vlgmr.msrb.gmra.mxu2 %vm23_vm0, %v605_v32  ;;  %423 = vmatpush.bf16.msra.mxu1 %v633_v58 }
  0x24   :  { %536 = vmatmul.msk.bf16.vlgmr.msrb.gmra.mxu3 %vm23_vm0, %v605_v32 }
  0x26   :  { %410 = vmatpush.bf16.msra.mxu0 %v624_v63 }
  0x27   :  { %424 = vmatpush.bf16.msra.mxu1 %v632_v0 }
  0x2a   :  { %411 = vmatpush.bf16.msra.mxu0 %v623_v1 }
  0x2b   :  { %425 = vmatpush.bf16.msra.mxu1 %v631_v2 }
  0x2e   :  { %412 = vmatpush.bf16.msra.mxu0 %v622_v10 }
  0x2f   :  { %426 = vmatpush.bf16.msra.mxu1 %v630_v11 }
  0x96   :  { %v846_v59 = vpop.f32.mrf.mxu2 }
  0x97   :  { %v537_v60 = vmul.f32 -1.442695, %v846_v59  ;;  %v849_v61 = vpop.f32.mrf.mxu3 }
  0x98   :  { %v538_v62 = vmul.f32 -1.442695, %v849_v61 }
  0x99   :  { %642 = vpow2.f32 %v537_v60 }
  0x9a   :  { %644 = vpow2.f32 %v538_v62 }
  0x9e   :  { %v864_v3 = vpop.f32.mrf.mxu2 }
  0x9f   :  { %v643_v4 = vpop.eup %642  ;;  %v539_v5 = vmul.f32 -1.442695, %v864_v3  ;;  %v867_v6 = vpop.f32.mrf.mxu3 }
  0xa0   :  { %v645_v7 = vpop.eup %644  ;;  %v201_v8 = vadd.f32 1.0, %v643_v4  ;;  %v540_v9 = vmul.f32 -1.442695, %v867_v6 }
  0xa1   :  { %v202_v12 = vadd.f32 1.0, %v645_v7  ;;  %646 = vpow2.f32 %v539_v5 }
  0xa2   :  { %648 = vrcp.f32 %v201_v8  ;;  %v216_v27 = vand.u32 2147483648, %v201_v8  ;;  %vm210_vm2 = vweird.f32 %v201_v8  ;;  %v214_v28 = vand.u32 2147483647, %v201_v8 }
  0xa3   :  { %650 = vrcp.f32 %v202_v12  ;;  %v229_v32 = vand.u32 2147483647, %v202_v12  ;;  %v231_v36 = vand.u32 2147483648, %v202_v12  ;;  %vm225_vm5 = vweird.f32 %v202_v12 }
  0xa4   :  { %652 = vpow2.f32 %v540_v9  ;;  %v217_v38 = vor.u32 1.1754944e-38, %v216_v27  ;;  %vm215_vm6 = vcmp.eq.f32.partialorder %v214_v28, 8.507059e+37 }
  0xa5   :  { %vm230_vm9 = vcmp.eq.f32.partialorder %v229_v32, 8.507059e+37  ;;  %v232_v48 = vor.u32 1.1754944e-38, %v231_v36 }
  0xa6   :  { %v170_v33 = vpop.f32.mrf.mxu2 }
  0xa7   :  { %v647_v13 = vpop.eup %646  ;;  %v184_v44 = vpop.f32.mrf.mxu3 }
  0xa8   :  { %v649_v14 = vpop.eup %648  ;;  %v203_v15 = vadd.f32 1.0, %v647_v13 }
  0xa9   :  { %v651_v16 = vpop.eup %650  ;;  %v206_v17 = vmul.f32 %v649_v14, %v201_v8  ;;  %vm211_vm1 = vweird.f32 %v649_v14 }
  0xaa   :  { %v653_v18 = vpop.eup %652  ;;  %v221_v19 = vmul.f32 %v651_v16, %v202_v12  ;;  %654 = vrcp.f32 %v203_v15  ;;  %vm876_vm3 = vmor %vm210_vm2, %vm211_vm1  ;;  %vm226_vm4 = vweird.f32 %v651_v16  ;;  %v246_v39 = vand.u32 2147483648, %v203_v15 }
  0xab   :  { %v207_v20 = vsub.f32 1.0, %v206_v17  ;;  %v204_v21 = vadd.f32 1.0, %v653_v18  ;;  %vm882_vm7 = vmor %vm225_vm5, %vm226_vm4  ;;  %v244_v43 = vand.u32 2147483647, %v203_v15  ;;  %vm240_vm10 = vweird.f32 %v203_v15 }
  0xac   :  { %v222_v22 = vsub.f32 1.0, %v221_v19  ;;  %v247_v51 = vor.u32 1.1754944e-38, %v246_v39  ;;  %vm444_vm2 = vcmask 519168  }
  0xad   :  { %v208_v23 = vmul.f32 %v649_v14, %v207_v20  ;;  %656 = vrcp.f32 %v204_v21  ;;  %v261_v50 = vand.u32 2147483648, %v204_v21  ;;  %v259_v53 = vand.u32 2147483647, %v204_v21 }
  0xae   :  { %v223_v24 = vmul.f32 %v651_v16, %v222_v22  ;;  %vm245_vm13 = vcmp.eq.f32.partialorder %v244_v43, 8.507059e+37  ;;  %vm255_vm14 = vweird.f32 %v204_v21  ;;  %v172_v1 = vpop.f32.mrf.mxu2 }
  0xaf   :  { %v209_v25 = vadd.f32 %v649_v14, %v208_v23  ;;  %v262_v62 = vor.u32 1.1754944e-38, %v261_v50  ;;  %vm260_vm1 = vcmp.eq.f32.partialorder %v259_v53, 8.507059e+37  ;;  %v186_v7 = vpop.f32.mrf.mxu3 }
  0xb0   :  { %v655_v26 = vpop.eup %654  ;;  %v224_v31 = vadd.f32 %v651_v16, %v223_v24 }
  0xb1   :  { %v236_v29 = vmul.f32 %v655_v26, %v203_v15  ;;  %v213_v35 = vsel %vm876_vm3, %v649_v14, %v209_v25  ;;  %vm241_vm8 = vweird.f32 %v655_v26 }
  0xb2   :  { %v218_v45 = vsel %vm215_vm6, %v217_v38, %v213_v35  ;;  %v228_v46 = vsel %vm882_vm7, %v651_v16, %v224_v31  ;;  %vm242_vm11 = vmor %vm240_vm10, %vm241_vm8 }
  0xb3   :  { %v657_v34 = vpop.eup %656  ;;  %v237_v37 = vsub.f32 1.0, %v236_v29  ;;  %v265_v54 = vmul.f32 %v218_v45, %v846_v59  ;;  %v233_v55 = vsel %vm230_vm9, %v232_v48, %v228_v46 }
  0xb4   :  { %v251_v40 = vmul.f32 %v657_v34, %v204_v21  ;;  %vm256_vm12 = vweird.f32 %v657_v34  ;;  %v266_v63 = vmul.f32 %v233_v55, %v849_v61 }
  0xb5   :  { %v238_v42 = vmul.f32 %v655_v26, %v237_v37  ;;  %vm257_vm15 = vmor %vm255_vm14, %vm256_vm12  ;;  %v269_v4 = vmul.f32 %v265_v54, %v170_v33 }
  0xb6   :  { %v252_v47 = vsub.f32 1.0, %v251_v40  ;;  %v270_v9 = vmul.f32 %v266_v63, %v184_v44 }
  0xb7   :  { %v239_v49 = vadd.f32 %v655_v26, %v238_v42 }
  0xb8   :  { %v253_v52 = vmul.f32 %v657_v34, %v252_v47 }
  0xb9   :  { %v243_v56 = vsel %vm242_vm11, %v655_v26, %v239_v49 }
  0xba   :  { %v248_v57 = vsel %vm245_vm13, %v247_v51, %v243_v56  ;;  %v254_v58 = vadd.f32 %v657_v34, %v253_v52 }
  0xbb   :  { %v267_v60 = vmul.f32 %v248_v57, %v864_v3  ;;  %v684_v3 = vmov 0.0  }
  0xbc   :  { %v258_v0 = vsel %vm257_vm15, %v657_v34, %v254_v58  ;;  %24 = vst.msk [vmem:[#allocation2] sm:$0xff] %vm23_vm0, %v684_v3 }
  0xbd   :  { %v263_v2 = vsel %vm260_vm1, %v262_v62, %v258_v0  ;;  %v271_v5 = vmul.f32 %v267_v60, %v172_v1  ;;  %25 = vst.msk [vmem:[#allocation2 + $0x8] sm:$0xff] %vm23_vm0, %v684_v3 }
  0xbe   :  { %v268_v59 = vmul.f32 %v263_v2, %v867_v6 }
  0xbf   :  { %v275_v8 = vpack.c.bf16 %v271_v5, %v269_v4 }
  0xc0   :  { %v272_v10 = vmul.f32 %v268_v59, %v186_v7 }
  0xc1   :  { %413 = vmatmul.bf16.vlgmr.msra.gmra.mxu0 %v275_v8 }
  0xc2   :  { %v276_v11 = vpack.c.bf16 %v272_v10, %v270_v9 }
  0xc3   :  { %v273_v12 = vld [vmem:[#allocation2] sm:$0xff] }
  0xc4   :  { %427 = vmatmul.bf16.vlgmr.msra.gmra.mxu1 %v276_v11  ;;  %v274_v16 = vld [vmem:[#allocation2 + $0x8] sm:$0xff] }
 0x13e   :  { %v414_v61 = vpop.f32.mrf.mxu0 }
 0x141   :  { %v428_v13 = vpop.f32.mrf.mxu1 }
 0x142   :  { %v429_v14 = vadd.f32 %v428_v13, %v414_v61 }
 0x144   :  { %v433_v15 = vadd.f32 %v429_v14, %v273_v12 }
 0x146   :  { %435 = vst.msk [vmem:[#allocation2] sm:$0xff] %vm23_vm0, %v433_v15  ;;  %v416_v6 = vpop.f32.mrf.mxu0 }
 0x149   :  { %v430_v17 = vpop.f32.mrf.mxu1 }
 0x14a   :  { %v431_v18 = vadd.f32 %v430_v17, %v416_v6 }
 0x14c   :  { %v434_v19 = vadd.f32 %v431_v18, %v274_v16 }
 0x14d   :  { %v440_v20 = vld [vmem:[#allocation2] sm:$0xff] }
 0x14e   :  { %436 = vst.msk [vmem:[#allocation2 + $0x8] sm:$0xff] %vm23_vm0, %v434_v19  ;;  %v442_v21 = vpack.c.bf16 %v440_v20, %v440_v20 }
 0x150   :  { %445 = vst.msk [vmem:[#allocation3] sm:$0xf] %vm444_vm2, %v442_v21 }
 0x155   :  { %v441_v22 = vld [vmem:[#allocation2 + $0x8] sm:$0xff] }
 0x156   :  { %v443_v23 = vpack.c.bf16 %v441_v22, %v441_v22 }
 0x158   :  { %446 = vst.msk [vmem:[#allocation3 + $0x4] sm:$0xf] %vm444_vm2, %v443_v23 }
 0x159   :  { %459 = dma.vmem_to_hbm [thread:$0]  %s452_s29, 128, %s454_s5, [#allocation4], %s686_s6, %s686_s6, %s687_s7  }
 0x15a   :  { %682 = dma.done.wait [#allocation4], 128  }
 0x15b   :  { %683 = vsyncadd [#allocation4], 4294967168 }
 0x15c   :  { %464 = vsyncpa [#allocation4], 1 }

</bundles_post_ra>
